<compile_context>
chip_gen: v5e
topology: v5e:2x2
jax: 0.10.0
libtpu: 0.0.40
codegen_flags: <defaults>
</compile_context>

<pallas_src>
import jax
import jax.numpy as jnp
from jax.experimental import pallas as pl
from jax.experimental.pallas import tpu as pltpu


def _round_up(x, m):
    return ((x + m - 1) // m) * m


def uniform_mask_policy_kernel(state_ref, mask_ref, w1_ref, b1_ref,
                               w2_ref, b2_ref, out_ref):
    # Mask multiply in f32 on the VPU (free filler under MXU/DMA slots);
    # MXU inputs in bf16; accumulation + bias/ReLU epilogue in f32.
    x = state_ref[...] * mask_ref[...]                       # (TB, D)  f32 VPU
    x = x.astype(w1_ref.dtype)                               # bf16 for the MXU
    h = jnp.dot(x, w1_ref[...], preferred_element_type=jnp.float32)
    h = jnp.maximum(h + b1_ref[...], 0.0)                    # (TB, H)  f32
    o = jnp.dot(h.astype(w2_ref.dtype), w2_ref[...],
                preferred_element_type=jnp.float32)
    out_ref[...] = (o + b2_ref[...]).astype(out_ref.dtype)   # (TB, A_out)


def uniform_mask_policy(state, mask, w1, b1, w2, b2, *,
                        block_b=1024,
                        compute_dtype=jnp.bfloat16,
                        lane_dense_out=True,
                        core_parallel=False):
    """UniformMaskPolicy.forward(state, mask) with net = Linear->ReLU->Linear."""
    B, D = state.shape
    H = w1.shape[1]
    A = w2.shape[1]

    # Mask stays a tiny resident (1, D) operand; applied in-kernel.
    mask2 = mask.astype(state.dtype).reshape(1, D)

    # Weights in bf16 for the MXU; biases kept f32 for the epilogue.
    w1c = w1.astype(compute_dtype)                            # (D, H)
    w2c = w2.astype(compute_dtype)                            # (H, A)
    b1r = b1.reshape(1, H).astype(jnp.float32)
    b2r = b2.reshape(1, A).astype(jnp.float32)

    # Output lane width: pad A -> 128 (full vst) for small/launch-bound B;
    # unpadded A (16x fewer writeback bytes) for large, writeback-bound B.
    A_out = _round_up(A, 128) if lane_dense_out else A
    if A_out != A:
        w2c = jnp.zeros((H, A_out), w2c.dtype).at[:, :A].set(w2c)
        b2r = jnp.zeros((1, A_out), jnp.float32).at[:, :A].set(b2r)

    # Batch tiling: one tile as big as block_b allows (per-step overhead
    # ~0.35us dominates at these shapes; VMEM even at TB=1024 is < 2 MiB on
    # every generation, including v7x's 64 MiB).
    TB = min(block_b, _round_up(B, 8))
    if core_parallel:
        # Need >= 2 grid steps so CORE_PARALLEL can split across the two TCs.
        TB = min(TB, _round_up(pl.cdiv(B, 2), 8))
    n_blocks = pl.cdiv(B, TB)
    B_pad = n_blocks * TB
    state_in = state if B_pad == B else jnp.pad(state, ((0, B_pad - B), (0, 0)))

    dims = (pltpu.CORE_PARALLEL,) if core_parallel else ("parallel",)

    itemsize = lambda a: a.dtype.itemsize
    cost = pl.CostEstimate(
        flops=2 * B_pad * (D * H + H * A_out),
        transcendentals=0,
        bytes_accessed=(state_in.size * itemsize(state_in)
                        + w1c.size * itemsize(w1c) + w2c.size * itemsize(w2c)
                        + 4 * (mask2.size + b1r.size + b2r.size)
                        + B_pad * A_out * itemsize(state)),
    )

    out_p = pl.pallas_call(
        uniform_mask_policy_kernel,
        out_shape=jax.ShapeDtypeStruct((B_pad, A_out), state.dtype),
        grid=(n_blocks,),
        in_specs=[
            pl.BlockSpec((TB, D), lambda i: (i, 0)),      # state tile (streamed)
            pl.BlockSpec((1, D), lambda i: (0, 0)),       # mask, VMEM-resident
            pl.BlockSpec((D, H), lambda i: (0, 0)),       # W1 (bf16), resident
            pl.BlockSpec((1, H), lambda i: (0, 0)),       # b1 (f32), resident
            pl.BlockSpec((H, A_out), lambda i: (0, 0)),   # W2 (bf16), resident
            pl.BlockSpec((1, A_out), lambda i: (0, 0)),   # b2 (f32), resident
        ],
        out_specs=pl.BlockSpec((TB, A_out), lambda i: (i, 0)),
        compiler_params=pltpu.CompilerParams(dimension_semantics=dims),
        cost_estimate=cost,
    )(state_in, mask2, w1c, b1r, w2c, b2r)

    if B_pad != B or A_out != A:
        out_p = out_p[:B, :A]
    return out_p


def reference(state, mask, w1, b1, w2, b2):
    x = state * mask.astype(state.dtype)          # broadcast == expand_as
    h = jnp.maximum(x @ w1 + b1.reshape(1, -1), 0.0)
    return h @ w2 + b2.reshape(1, -1)


if __name__ == "__main__":
    key = jax.random.PRNGKey(0)
    k_state, k_mask, k_w1, k_b1, k_w2, k_b2 = jax.random.split(key, 6)

    # Batch of 256 rows -> TB=256, grid=(1,): a single grid step per call.
    B, D, H, A = 256, 32, 64, 8

    state = jax.random.normal(k_state, (B, D), dtype=jnp.float32)
    # Uniform binary mask over state features (cast to state dtype, like .to(state))
    mask = (jax.random.uniform(k_mask, (1, D)) > 0.5).astype(jnp.float32)

    # Deterministic parameter init for the wrapped `net` (MLP policy head)
    w1 = jax.random.normal(k_w1, (D, H), dtype=jnp.float32) * (1.0 / jnp.sqrt(D))
    b1 = jax.random.normal(k_b1, (1, H), dtype=jnp.float32) * 0.01
    w2 = jax.random.normal(k_w2, (H, A), dtype=jnp.float32) * (1.0 / jnp.sqrt(H))
    b2 = jax.random.normal(k_b2, (1, A), dtype=jnp.float32) * 0.01

    out = uniform_mask_policy(state, mask, w1, b1, w2, b2)
    out = jax.block_until_ready(out)

    ref = reference(state, mask, w1, b1, w2, b2)
    assert out.shape == (B, A), out.shape
    # Tolerance loosened for bf16 MXU inputs (f32 accumulation).
    assert jnp.allclose(out, ref, atol=5e-2, rtol=5e-2), "mismatch vs reference"

    print("KERNEL_OK")
</pallas_src>

<mosaic_0001>
module attributes {stable_mosaic.version = 11 : i64} {
  func.func @uniform_mask_policy_kernel(%arg0: i32, %arg1: memref<256x32xf32, #tpu.memory_space<vmem>>, %arg2: memref<1x32xf32, #tpu.memory_space<vmem>>, %arg3: memref<32x64xbf16, #tpu.memory_space<vmem>>, %arg4: memref<1x64xf32, #tpu.memory_space<vmem>>, %arg5: memref<64x128xbf16, #tpu.memory_space<vmem>>, %arg6: memref<1x128xf32, #tpu.memory_space<vmem>>, %arg7: memref<256x128xf32, #tpu.memory_space<vmem>>) attributes {dimension_semantics = [#tpu.dimension_semantics<parallel>], iteration_bounds = array<i64: 1>, scalar_prefetch = 0 : i64, scratch_operands = 0 : i64, tpu.core_type = #tpu.core_type<tc>, window_params = [{transform_indices = @transform_0, window_bounds = array<i64: 256, 32>}, {pipeline_mode = #tpu.pipeline_mode<synchronous>, transform_indices = @transform_1, window_bounds = array<i64: 1, 32>}, {pipeline_mode = #tpu.pipeline_mode<synchronous>, transform_indices = @transform_2, window_bounds = array<i64: 32, 64>}, {pipeline_mode = #tpu.pipeline_mode<synchronous>, transform_indices = @transform_3, window_bounds = array<i64: 1, 64>}, {pipeline_mode = #tpu.pipeline_mode<synchronous>, transform_indices = @transform_4, window_bounds = array<i64: 64, 128>}, {pipeline_mode = #tpu.pipeline_mode<synchronous>, transform_indices = @transform_5, window_bounds = array<i64: 1, 128>}, {transform_indices = @transform_6, window_bounds = array<i64: 256, 128>}]} {
    %c0 = arith.constant 0 : index
    %c0_0 = arith.constant 0 : index
    %0 = vector.load %arg1[%c0, %c0_0] : memref<256x32xf32, #tpu.memory_space<vmem>>, vector<256x32xf32>
    %c0_1 = arith.constant 0 : index
    %c0_2 = arith.constant 0 : index
    %1 = vector.load %arg2[%c0_1, %c0_2] : memref<1x32xf32, #tpu.memory_space<vmem>>, vector<1x32xf32>
    %2 = vector.broadcast %1 : vector<1x32xf32> to vector<256x32xf32>
    %3 = arith.mulf %0, %2 : vector<256x32xf32>
    %4 = arith.truncf %3 : vector<256x32xf32> to vector<256x32xbf16>
    %c0_3 = arith.constant 0 : index
    %c0_4 = arith.constant 0 : index
    %5 = vector.load %arg3[%c0_3, %c0_4] : memref<32x64xbf16, #tpu.memory_space<vmem>>, vector<32x64xbf16>
    %cst = arith.constant dense<0.000000e+00> : vector<256x64xf32>
    %6 = tpu.matmul %4, %5, %cst {dimension_numbers = #tpu.dot_dimension_numbers<[1], [0], [0], [1], [0, 0, 1, 1], [], []>} : vector<256x32xbf16>, vector<32x64xbf16>, vector<256x64xf32> -> vector<256x64xf32>
    %c0_5 = arith.constant 0 : index
    %c0_6 = arith.constant 0 : index
    %7 = vector.load %arg4[%c0_5, %c0_6] : memref<1x64xf32, #tpu.memory_space<vmem>>, vector<1x64xf32>
    %8 = vector.broadcast %7 : vector<1x64xf32> to vector<256x64xf32>
    %9 = arith.addf %6, %8 : vector<256x64xf32>
    %cst_7 = arith.constant 0.000000e+00 : f32
    %10 = vector.broadcast %cst_7 : f32 to vector<256x64xf32>
    %11 = arith.maximumf %9, %10 : vector<256x64xf32>
    %12 = arith.truncf %11 : vector<256x64xf32> to vector<256x64xbf16>
    %c0_8 = arith.constant 0 : index
    %c0_9 = arith.constant 0 : index
    %13 = vector.load %arg5[%c0_8, %c0_9] : memref<64x128xbf16, #tpu.memory_space<vmem>>, vector<64x128xbf16>
    %cst_10 = arith.constant dense<0.000000e+00> : vector<256x128xf32>
    %14 = tpu.matmul %12, %13, %cst_10 {dimension_numbers = #tpu.dot_dimension_numbers<[1], [0], [0], [1], [0, 0, 1, 1], [], []>} : vector<256x64xbf16>, vector<64x128xbf16>, vector<256x128xf32> -> vector<256x128xf32>
    %c0_11 = arith.constant 0 : index
    %c0_12 = arith.constant 0 : index
    %15 = vector.load %arg6[%c0_11, %c0_12] : memref<1x128xf32, #tpu.memory_space<vmem>>, vector<1x128xf32>
    %16 = vector.broadcast %15 : vector<1x128xf32> to vector<256x128xf32>
    %17 = arith.addf %14, %16 : vector<256x128xf32>
    %c0_13 = arith.constant 0 : index
    %c0_14 = arith.constant 0 : index
    %18 = vector.load %arg7[%c0_13, %c0_14] : memref<256x128xf32, #tpu.memory_space<vmem>>, vector<256x128xf32>
    tpu.vector_store %arg7[%c0_13, %c0_14], %17 {strides = array<i32>} : memref<256x128xf32, #tpu.memory_space<vmem>>, vector<256x128xf32>,
    return
  }
  func.func @transform_0(%arg0: i32) -> (i32, i32) {
    %c0_i32 = arith.constant 0 : i32
    %c0_i32_0 = arith.constant 0 : i32
    return %arg0, %c0_i32 : i32, i32
  }
  func.func @transform_1(%arg0: i32) -> (i32, i32) {
    %c0_i32 = arith.constant 0 : i32
    %c0_i32_0 = arith.constant 0 : i32
    %c0_i32_1 = arith.constant 0 : i32
    return %c0_i32, %c0_i32_0 : i32, i32
  }
  func.func @transform_2(%arg0: i32) -> (i32, i32) {
    %c0_i32 = arith.constant 0 : i32
    %c0_i32_0 = arith.constant 0 : i32
    %c0_i32_1 = arith.constant 0 : i32
    return %c0_i32, %c0_i32_0 : i32, i32
  }
  func.func @transform_3(%arg0: i32) -> (i32, i32) {
    %c0_i32 = arith.constant 0 : i32
    %c0_i32_0 = arith.constant 0 : i32
    %c0_i32_1 = arith.constant 0 : i32
    return %c0_i32, %c0_i32_0 : i32, i32
  }
  func.func @transform_4(%arg0: i32) -> (i32, i32) {
    %c0_i32 = arith.constant 0 : i32
    %c0_i32_0 = arith.constant 0 : i32
    %c0_i32_1 = arith.constant 0 : i32
    return %c0_i32, %c0_i32_0 : i32, i32
  }
  func.func @transform_5(%arg0: i32) -> (i32, i32) {
    %c0_i32 = arith.constant 0 : i32
    %c0_i32_0 = arith.constant 0 : i32
    %c0_i32_1 = arith.constant 0 : i32
    return %c0_i32, %c0_i32_0 : i32, i32
  }
  func.func @transform_6(%arg0: i32) -> (i32, i32) {
    %c0_i32 = arith.constant 0 : i32
    %c0_i32_0 = arith.constant 0 : i32
    return %arg0, %c0_i32 : i32, i32
  }
}

</mosaic_0001>

<bundles_post_ra>
// kernel: tpu_custom_call.1
= control target key start
LH: loop header
LB: loop body
LE: loop exit
PB: predicated region body
PF: predicated region fallthrough
CT: control target
= control target key end

     0   :  { %s937_s0 = inlined_call_operand.vmem [shape: f32[256,32], index: 0, kind: input, shape index: {}]   ;;  %s938_s1 = inlined_call_operand.vmem [shape: f32[1,32], index: 1, kind: input, shape index: {}]   ;;  %s939_s2 = inlined_call_operand.vmem [shape: bf16[32,64], index: 2, kind: input, shape index: {}]   ;;  %s940_s3 = inlined_call_operand.vmem [shape: f32[1,64], index: 3, kind: input, shape index: {}]   ;;  %s941_s4 = inlined_call_operand.vmem [shape: bf16[64,128], index: 4, kind: input, shape index: {}]   ;;  %s942_s5 = inlined_call_operand.vmem [shape: f32[1,128], index: 5, kind: input, shape index: {}]   ;;  %s943_s6 = inlined_call_operand.hbm [shape: f32[256,128], index: 6, kind: output, shape index: {}]  }
   0x1   :  { %v596_v0 = vld [vmem:[%s939_s2 + $0x8] sm:$0xff]  ;;  %v25_v1 = vld [vmem:[%s937_s0] sm:$0xff] }
   0x2   :  { %v26_v2 = vld [vmem:[%s937_s0 + $0x8] sm:$0xff]  ;;  %v689_v3 = vld [vmem:[%s938_s1] ss:$0 sm:$0xff]  ;;  %184 = vmatpush.bf16.msra.mxu0 %v596_v0  ;;  %601 = vmatpush.bf16.msra.mxu3 %v596_v0 }
   0x3   :  { %v595_v4 = vld [vmem:[%s939_s2] sm:$0xff]  ;;  %v61_v5 = vmul.f32 %v689_v3, %v25_v1  ;;  %v62_v6 = vmul.f32 %v689_v3, %v26_v2 }
   0x4   :  { %11 = vsyncpa [#allocation3], 0  ;;  %vm129_vm0 = vcmask 261120   ;;  %v27_v8 = vld [vmem:[%s937_s0 + $0x10] sm:$0xff]  ;;  %v28_v9 = vld [vmem:[%s937_s0 + $0x18] sm:$0xff]  ;;  %vm351_vm1 = vcmask 523264  }
   0x5   :  { %v93_v7 = vpack.c.bf16 %v62_v6, %v61_v5  ;;  %v63_v10 = vmul.f32 %v689_v3, %v27_v8  ;;  %v64_v11 = vmul.f32 %v689_v3, %v28_v9  ;;  %v29_v13 = vld [vmem:[%s937_s0 + $0x20] sm:$0xff]  ;;  %v30_v14 = vld [vmem:[%s937_s0 + $0x28] sm:$0xff]  ;;  %v31_v18 = vld [vmem:[%s937_s0 + $0x30] sm:$0xff]  ;;  %s527_s24 = sshll.u32 %s943_s6, 4  ;;  %s640_s25 = smov 128   ;;  %s528_s24 = int_to_ptr.hbm [resolvable:$true] %s527_s24 }
   0x6   :  { %185 = vmatpush.bf16.msra.mxu0 %v595_v4  ;;  %602 = vmatpush.bf16.msra.mxu3 %v595_v4  ;;  %v65_v15 = vmul.f32 %v689_v3, %v29_v13  ;;  %v66_v16 = vmul.f32 %v689_v3, %v30_v14  ;;  %v32_v19 = vld [vmem:[%s937_s0 + $0x38] sm:$0xff]  ;;  %v67_v20 = vmul.f32 %v689_v3, %v31_v18  ;;  %v33_v23 = vld [vmem:[%s937_s0 + $0x40] sm:$0xff]  ;;  %v34_v24 = vld [vmem:[%s937_s0 + $0x48] sm:$0xff]  ;;  %s641_s26 = smov 8  }
   0x7   :  { %v94_v12 = vpack.c.bf16 %v64_v11, %v63_v10  ;;  %v68_v21 = vmul.f32 %v689_v3, %v32_v19  ;;  %v69_v25 = vmul.f32 %v689_v3, %v33_v23  ;;  %v70_v26 = vmul.f32 %v689_v3, %v34_v24  ;;  %v35_v28 = vld [vmem:[%s937_s0 + $0x50] sm:$0xff]  ;;  %v36_v29 = vld [vmem:[%s937_s0 + $0x58] sm:$0xff]  ;;  %v37_v33 = vld [vmem:[%s937_s0 + $0x60] sm:$0xff] }
   0x8   :  { %v95_v17 = vpack.c.bf16 %v66_v16, %v65_v15  ;;  %v71_v30 = vmul.f32 %v689_v3, %v35_v28  ;;  %v72_v31 = vmul.f32 %v689_v3, %v36_v29  ;;  %v38_v34 = vld [vmem:[%s937_s0 + $0x68] sm:$0xff]  ;;  %v73_v35 = vmul.f32 %v689_v3, %v37_v33  ;;  %v600_v37 = vld [vmem:[%s941_s4 + $0x18] sm:$0xff]  ;;  %v43_v39 = vld [vmem:[%s937_s0 + $0x90] sm:$0xff] }
   0x9   :  { %547 = vmatmul.msk.bf16.vlgmr.msra.gmra.mxu0 %vm129_vm0, %v93_v7  ;;  %v96_v22 = vpack.c.bf16 %v68_v21, %v67_v20  ;;  %v97_v27 = vpack.c.bf16 %v70_v26, %v69_v25  ;;  %v74_v36 = vmul.f32 %v689_v3, %v38_v34  ;;  %404 = vmatpush.bf16.msra.mxu1 %v600_v37  ;;  %v44_v40 = vld [vmem:[%s937_s0 + $0x98] sm:$0xff]  ;;  %v599_v43 = vld [vmem:[%s941_s4 + $0x10] sm:$0xff]  ;;  %v598_v45 = vld [vmem:[%s941_s4 + $0x8] sm:$0xff] }
   0xa   :  { %v98_v32 = vpack.c.bf16 %v72_v31, %v71_v30  ;;  %603 = vmatpush.bf16.msra.mxu2 %v600_v37  ;;  %v79_v41 = vmul.f32 %v689_v3, %v43_v39  ;;  %v80_v42 = vmul.f32 %v689_v3, %v44_v40  ;;  %v39_v46 = vld [vmem:[%s937_s0 + $0x70] sm:$0xff]  ;;  %v40_v47 = vld [vmem:[%s937_s0 + $0x78] sm:$0xff]  ;;  %v597_v48 = vld [vmem:[%s941_s4] sm:$0xff] }
   0xb   :  { %v99_v38 = vpack.c.bf16 %v74_v36, %v73_v35  ;;  %v75_v49 = vmul.f32 %v689_v3, %v39_v46  ;;  %v76_v50 = vmul.f32 %v689_v3, %v40_v47  ;;  %v45_v52 = vld [vmem:[%s937_s0 + $0xa0] sm:$0xff]  ;;  %v46_v53 = vld [vmem:[%s937_s0 + $0xa8] sm:$0xff]  ;;  %v47_v63 = vld [vmem:[%s937_s0 + $0xb0] sm:$0xff] }
   0xc   :  { %v102_v44 = vpack.c.bf16 %v80_v42, %v79_v41  ;;  %v81_v54 = vmul.f32 %v689_v3, %v45_v52  ;;  %v82_v55 = vmul.f32 %v689_v3, %v46_v53  ;;  %v41_v57 = vld [vmem:[%s937_s0 + $0x80] sm:$0xff]  ;;  %v42_v58 = vld [vmem:[%s937_s0 + $0x88] sm:$0xff]  ;;  %v48_v0 = vld [vmem:[%s937_s0 + $0xb8] sm:$0xff]  ;;  %v83_v1 = vmul.f32 %v689_v3, %v47_v63 }
   0xd   :  { %405 = vmatpush.bf16.msra.mxu1 %v599_v43  ;;  %v100_v51 = vpack.c.bf16 %v76_v50, %v75_v49  ;;  %v77_v59 = vmul.f32 %v689_v3, %v41_v57  ;;  %v78_v60 = vmul.f32 %v689_v3, %v42_v58  ;;  %v84_v2 = vmul.f32 %v689_v3, %v48_v0  ;;  %v809_v4 = vld [vmem:[%s940_s3] ss:$0 sm:$0xff]  ;;  %v50_v14 = vld [vmem:[%s937_s0 + $0xc8] sm:$0xff]  ;;  %v51_v25 = vld [vmem:[%s937_s0 + $0xd0] sm:$0xff] }
   0xe   :  { %604 = vmatpush.bf16.msra.mxu2 %v599_v43  ;;  %556 = vmatmul.msk.bf16.vlgmr.msra.gmra.mxu3 %vm129_vm0, %v102_v44  ;;  %v103_v56 = vpack.c.bf16 %v82_v55, %v81_v54  ;;  %v49_v13 = vld [vmem:[%s937_s0 + $0xc0] sm:$0xff]  ;;  %v86_v16 = vmul.f32 %v689_v3, %v50_v14  ;;  %v52_v26 = vld [vmem:[%s937_s0 + $0xd8] sm:$0xff]  ;;  %v55_v49 = vld [vmem:[%s937_s0 + $0xf0] sm:$0xff] }
   0xf   :  { %v101_v61 = vpack.c.bf16 %v78_v60, %v77_v59  ;;  %v104_v5 = vpack.c.bf16 %v84_v2, %v83_v1  ;;  %v85_v15 = vmul.f32 %v689_v3, %v49_v13  ;;  %v88_v28 = vmul.f32 %v689_v3, %v52_v26  ;;  %v53_v37 = vld [vmem:[%s937_s0 + $0xe0] sm:$0xff]  ;;  %v56_v50 = vld [vmem:[%s937_s0 + $0xf8] sm:$0xff] }
  0x10   :  { %v89_v39 = vmul.f32 %v689_v3, %v53_v37  ;;  %v92_v52 = vmul.f32 %v689_v3, %v56_v50 }
  0x11   :  { %406 = vmatpush.bf16.msra.mxu1 %v598_v45 }
  0x12   :  { %605 = vmatpush.bf16.msra.mxu2 %v598_v45 }
  0x15   :  { %407 = vmatpush.bf16.msra.mxu1 %v597_v48 }
  0x16   :  { %606 = vmatpush.bf16.msra.mxu2 %v597_v48 }
  0x19   :  { %548 = vmatmul.msk.bf16.gmra.mxu0 %vm129_vm0, %v94_v12 }
  0x1e   :  { %557 = vmatmul.msk.bf16.gmra.mxu3 %vm129_vm0, %v103_v56 }
  0x29   :  { %549 = vmatmul.msk.bf16.gmra.mxu0 %vm129_vm0, %v95_v17  ;;  %v105_v17 = vpack.c.bf16 %v86_v16, %v85_v15 }
  0x2e   :  { %558 = vmatmul.msk.bf16.gmra.mxu3 %vm129_vm0, %v104_v5 }
  0x39   :  { %550 = vmatmul.msk.bf16.gmra.mxu0 %vm129_vm0, %v96_v22 }
  0x3e   :  { %559 = vmatmul.msk.bf16.gmra.mxu3 %vm129_vm0, %v105_v17 }
  0x49   :  { %551 = vmatmul.msk.bf16.gmra.mxu0 %vm129_vm0, %v97_v27  ;;  %v87_v27 = vmul.f32 %v689_v3, %v51_v25  ;;  %v878_v25 = vld [vmem:[%s942_s5] ss:$0 sm:$0xff]  ;;  %s639_s5 = smov [#allocation2]  }
  0x4a   :  { %s525_s22 = sshll.u32 %s639_s5, 4  ;;  %s526_s22 = int_to_ptr.vmem [resolvable:$true] %s525_s22 }
  0x4b   :  { %v106_v29 = vpack.c.bf16 %v88_v28, %v87_v27 }
  0x4e   :  { %560 = vmatmul.msk.bf16.gmra.mxu3 %vm129_vm0, %v106_v29 }
  0x59   :  { %552 = vmatmul.msk.bf16.gmra.mxu0 %vm129_vm0, %v98_v32 }
  0x69   :  { %553 = vmatmul.msk.bf16.gmra.mxu0 %vm129_vm0, %v99_v38  ;;  %v54_v38 = vld [vmem:[%s937_s0 + $0xe8] sm:$0xff] }
  0x6a   :  { %v90_v40 = vmul.f32 %v689_v3, %v54_v38 }
  0x6c   :  { %v107_v41 = vpack.c.bf16 %v90_v40, %v89_v39 }
  0x6e   :  { %561 = vmatmul.msk.bf16.gmra.mxu3 %vm129_vm0, %v107_v41 }
  0x79   :  { %554 = vmatmul.msk.bf16.gmra.mxu0 %vm129_vm0, %v100_v51  ;;  %v91_v51 = vmul.f32 %v689_v3, %v55_v49 }
  0x7b   :  { %v108_v53 = vpack.c.bf16 %v92_v52, %v91_v51 }
  0x7e   :  { %562 = vmatmul.msk.bf16.gmra.mxu3 %vm129_vm0, %v108_v53 }
  0x86   :  { %v187_v62 = vpop.f32.mrf.mxu0 }
  0x87   :  { %v188_v6 = vadd.f32 %v809_v4, %v187_v62 }
  0x89   :  { %555 = vmatmul.msk.bf16.gmra.mxu0 %vm129_vm0, %v101_v61  ;;  %v267_v9 = vmax.f32 %v188_v6, 0.0 }
  0x8e   :  { %v189_v7 = vpop.f32.mrf.mxu0 }
  0x8f   :  { %v190_v8 = vadd.f32 %v809_v4, %v189_v7 }
  0x91   :  { %v268_v10 = vmax.f32 %v190_v8, 0.0 }
  0x93   :  { %v299_v11 = vpack.c.bf16 %v268_v10, %v267_v9 }
  0x95   :  { %579 = vmatmul.msk.bf16.vlgmr.msra.gmra.mxu1 %vm351_vm1, %v299_v11 }
  0x96   :  { %v192_v12 = vpop.f32.mrf.mxu0 }
  0x97   :  { %v193_v18 = vadd.f32 %v809_v4, %v192_v12  ;;  %v232_v12 = vpop.f32.mrf.mxu3 }
  0x99   :  { %v269_v21 = vmax.f32 %v193_v18, 0.0 }
  0x9e   :  { %v194_v19 = vpop.f32.mrf.mxu0 }
  0x9f   :  { %v195_v20 = vadd.f32 %v809_v4, %v194_v19  ;;  %v234_v16 = vpop.f32.mrf.mxu3 }
  0xa1   :  { %v270_v22 = vmax.f32 %v195_v20, 0.0 }
  0xa3   :  { %v300_v23 = vpack.c.bf16 %v270_v22, %v269_v21 }
  0xa5   :  { %580 = vmatmul.msk.bf16.gmra.mxu1 %vm351_vm1, %v300_v23 }
  0xa6   :  { %v197_v24 = vpop.f32.mrf.mxu0 }
  0xa7   :  { %v198_v30 = vadd.f32 %v809_v4, %v197_v24  ;;  %v237_v21 = vpop.f32.mrf.mxu3 }
  0xa9   :  { %v271_v33 = vmax.f32 %v198_v30, 0.0 }
  0xae   :  { %v199_v31 = vpop.f32.mrf.mxu0 }
  0xaf   :  { %v200_v32 = vadd.f32 %v809_v4, %v199_v31  ;;  %v239_v31 = vpop.f32.mrf.mxu3 }
  0xb1   :  { %v272_v34 = vmax.f32 %v200_v32, 0.0 }
  0xb3   :  { %v301_v35 = vpack.c.bf16 %v272_v34, %v271_v33  ;;  %v233_v33 = vadd.f32 %v809_v4, %v232_v12  ;;  %v235_v34 = vadd.f32 %v809_v4, %v234_v16 }
  0xb5   :  { %581 = vmatmul.msk.bf16.gmra.mxu1 %vm351_vm1, %v301_v35  ;;  %v285_v37 = vmax.f32 %v233_v33, 0.0  ;;  %v286_v38 = vmax.f32 %v235_v34, 0.0 }
  0xb6   :  { %v202_v36 = vpop.f32.mrf.mxu0 }
  0xb7   :  { %v203_v42 = vadd.f32 %v809_v4, %v202_v36  ;;  %v242_v36 = vpop.f32.mrf.mxu3  ;;  %v308_v40 = vpack.c.bf16 %v286_v38, %v285_v37 }
  0xb9   :  { %v273_v45 = vmax.f32 %v203_v42, 0.0 }
  0xbe   :  { %v204_v43 = vpop.f32.mrf.mxu0 }
  0xbf   :  { %v205_v44 = vadd.f32 %v809_v4, %v204_v43  ;;  %v244_v42 = vpop.f32.mrf.mxu3 }
  0xc1   :  { %v274_v46 = vmax.f32 %v205_v44, 0.0  ;;  %v238_v44 = vadd.f32 %v809_v4, %v237_v21 }
  0xc3   :  { %v302_v47 = vpack.c.bf16 %v274_v46, %v273_v45  ;;  %v240_v45 = vadd.f32 %v809_v4, %v239_v31 }
  0xc5   :  { %582 = vmatmul.msk.bf16.gmra.mxu1 %vm351_vm1, %v302_v47  ;;  %v287_v47 = vmax.f32 %v238_v44, 0.0 }
  0xc6   :  { %v207_v48 = vpop.f32.mrf.mxu0 }
  0xc7   :  { %v208_v54 = vadd.f32 %v809_v4, %v207_v48  ;;  %v288_v48 = vmax.f32 %v240_v45, 0.0  ;;  %v247_v50 = vpop.f32.mrf.mxu3 }
  0xc9   :  { %v275_v57 = vmax.f32 %v208_v54, 0.0  ;;  %v309_v51 = vpack.c.bf16 %v288_v48, %v287_v47  ;;  %v243_v54 = vadd.f32 %v809_v4, %v242_v36 }
  0xce   :  { %v209_v55 = vpop.f32.mrf.mxu0 }
  0xcf   :  { %v210_v56 = vadd.f32 %v809_v4, %v209_v55  ;;  %v245_v55 = vadd.f32 %v809_v4, %v244_v42 }
  0xd1   :  { %v276_v58 = vmax.f32 %v210_v56, 0.0 }
  0xd3   :  { %v303_v59 = vpack.c.bf16 %v276_v58, %v275_v57  ;;  %v249_v57 = vpop.f32.mrf.mxu3  ;;  %v289_v58 = vmax.f32 %v243_v54, 0.0 }
  0xd5   :  { %583 = vmatmul.msk.bf16.gmra.mxu1 %vm351_vm1, %v303_v59  ;;  %v290_v59 = vmax.f32 %v245_v55, 0.0 }
  0xd6   :  { %v212_v60 = vpop.f32.mrf.mxu0 }
  0xd7   :  { %v213_v61 = vadd.f32 %v809_v4, %v212_v60 }
  0xd9   :  { %v277_v3 = vmax.f32 %v213_v61, 0.0  ;;  %v310_v61 = vpack.c.bf16 %v290_v59, %v289_v58 }
  0xde   :  { %v214_v62 = vpop.f32.mrf.mxu0 }
  0xdf   :  { %v215_v63 = vadd.f32 %v809_v4, %v214_v62 }
  0xe1   :  { %v278_v0 = vmax.f32 %v215_v63, 0.0  ;;  %v252_v63 = vpop.f32.mrf.mxu3 }
  0xe3   :  { %v304_v1 = vpack.c.bf16 %v278_v0, %v277_v3  ;;  %v248_v0 = vadd.f32 %v809_v4, %v247_v50 }
  0xe5   :  { %584 = vmatmul.msk.bf16.gmra.mxu1 %vm351_vm1, %v304_v1  ;;  %v250_v1 = vadd.f32 %v809_v4, %v249_v57 }
  0xe6   :  { %v217_v2 = vpop.f32.mrf.mxu0 }
  0xe7   :  { %v218_v5 = vadd.f32 %v809_v4, %v217_v2 }
  0xe9   :  { %v279_v8 = vmax.f32 %v218_v5, 0.0  ;;  %v291_v5 = vmax.f32 %v248_v0, 0.0 }
  0xee   :  { %v219_v6 = vpop.f32.mrf.mxu0 }
  0xef   :  { %v220_v7 = vadd.f32 %v809_v4, %v219_v6  ;;  %v292_v6 = vmax.f32 %v250_v1, 0.0 }
  0xf1   :  { %v280_v9 = vmax.f32 %v220_v7, 0.0  ;;  %v254_v7 = vpop.f32.mrf.mxu3 }
  0xf3   :  { %v305_v10 = vpack.c.bf16 %v280_v9, %v279_v8  ;;  %v311_v9 = vpack.c.bf16 %v292_v6, %v291_v5 }
  0xf5   :  { %585 = vmatmul.msk.bf16.gmra.mxu1 %vm351_vm1, %v305_v10 }
  0xf6   :  { %v222_v11 = vpop.f32.mrf.mxu0 }
  0xf7   :  { %v223_v13 = vadd.f32 %v809_v4, %v222_v11 }
  0xf9   :  { %v281_v17 = vmax.f32 %v223_v13, 0.0  ;;  %v257_v12 = vpop.f32.mrf.mxu3  ;;  %v253_v13 = vadd.f32 %v809_v4, %v252_v63 }
  0xfb   :  { %v293_v16 = vmax.f32 %v253_v13, 0.0 }
  0xfe   :  { %v224_v14 = vpop.f32.mrf.mxu0 }
  0xff   :  { %v225_v15 = vadd.f32 %v809_v4, %v224_v14  ;;  %v255_v14 = vadd.f32 %v809_v4, %v254_v7 }
 0x101   :  { %v282_v18 = vmax.f32 %v225_v15, 0.0  ;;  %v259_v21 = vpop.f32.mrf.mxu3 }
 0x103   :  { %v306_v19 = vpack.c.bf16 %v282_v18, %v281_v17  ;;  %v294_v17 = vmax.f32 %v255_v14, 0.0 }
 0x105   :  { %586 = vmatmul.msk.bf16.gmra.mxu1 %vm351_vm1, %v306_v19  ;;  %v312_v19 = vpack.c.bf16 %v294_v17, %v293_v16 }
 0x106   :  { %v227_v20 = vpop.f32.mrf.mxu0 }
 0x107   :  { %v228_v22 = vadd.f32 %v809_v4, %v227_v20 }
 0x109   :  { %v283_v26 = vmax.f32 %v228_v22, 0.0 }
 0x10e   :  { %v229_v23 = vpop.f32.mrf.mxu0 }
 0x10f   :  { %v230_v24 = vadd.f32 %v809_v4, %v229_v23  ;;  %v258_v23 = vadd.f32 %v809_v4, %v257_v12 }
 0x111   :  { %v284_v27 = vmax.f32 %v230_v24, 0.0  ;;  %v260_v24 = vadd.f32 %v809_v4, %v259_v21 }
 0x112   :  { %v409_v28 = vpop.f32.mrf.mxu1 }
 0x113   :  { %v307_v29 = vpack.c.bf16 %v284_v27, %v283_v26  ;;  %v410_v30 = vadd.f32 %v878_v25, %v409_v28  ;;  %v262_v27 = vpop.f32.mrf.mxu3  ;;  %v295_v28 = vmax.f32 %v258_v23, 0.0 }
 0x115   :  { %489 = vst [vmem:[#allocation2] sm:$0xff] %v410_v30  ;;  %587 = vmatmul.msk.bf16.vlgmr.msra.gmra.mxu2 %vm351_vm1, %v307_v29  ;;  %v296_v29 = vmax.f32 %v260_v24, 0.0 }
 0x117   :  { %v313_v31 = vpack.c.bf16 %v296_v29, %v295_v28 }
 0x11a   :  { %v411_v32 = vpop.f32.mrf.mxu1 }
 0x11b   :  { %v412_v35 = vadd.f32 %v878_v25, %v411_v32  ;;  %v264_v33 = vpop.f32.mrf.mxu3 }
 0x11c   :  { %v265_v36 = vadd.f32 %v809_v4, %v264_v33 }
 0x11d   :  { %490 = vst [vmem:[#allocation2 + $0x8] sm:$0xff] %v412_v35  ;;  %v263_v35 = vadd.f32 %v809_v4, %v262_v27 }
 0x11f   :  { %v297_v38 = vmax.f32 %v263_v35, 0.0 }
 0x122   :  { %v414_v39 = vpop.f32.mrf.mxu1 }
 0x123   :  { %v415_v41 = vadd.f32 %v878_v25, %v414_v39  ;;  %v298_v39 = vmax.f32 %v265_v36, 0.0 }
 0x125   :  { %491 = vst [vmem:[#allocation2 + $0x10] sm:$0xff] %v415_v41  ;;  %588 = vmatmul.msk.bf16.gmra.mxu2 %vm351_vm1, %v308_v40  ;;  %v314_v41 = vpack.c.bf16 %v298_v39, %v297_v38 }
 0x12a   :  { %v416_v43 = vpop.f32.mrf.mxu1 }
 0x12b   :  { %v417_v46 = vadd.f32 %v878_v25, %v416_v43 }
 0x12d   :  { %492 = vst [vmem:[#allocation2 + $0x18] sm:$0xff] %v417_v46 }
 0x132   :  { %v419_v49 = vpop.f32.mrf.mxu1 }
 0x133   :  { %v420_v52 = vadd.f32 %v878_v25, %v419_v49 }
 0x135   :  { %493 = vst [vmem:[#allocation2 + $0x20] sm:$0xff] %v420_v52  ;;  %589 = vmatmul.msk.bf16.gmra.mxu2 %vm351_vm1, %v309_v51 }
 0x13a   :  { %v421_v53 = vpop.f32.mrf.mxu1 }
 0x13b   :  { %v422_v56 = vadd.f32 %v878_v25, %v421_v53 }
 0x13d   :  { %494 = vst [vmem:[#allocation2 + $0x28] sm:$0xff] %v422_v56 }
 0x142   :  { %v424_v60 = vpop.f32.mrf.mxu1 }
 0x143   :  { %v425_v62 = vadd.f32 %v878_v25, %v424_v60 }
 0x145   :  { %495 = vst [vmem:[#allocation2 + $0x30] sm:$0xff] %v425_v62  ;;  %590 = vmatmul.msk.bf16.gmra.mxu2 %vm351_vm1, %v310_v61 }
 0x14a   :  { %v426_v3 = vpop.f32.mrf.mxu1 }
 0x14b   :  { %v427_v2 = vadd.f32 %v878_v25, %v426_v3 }
 0x14d   :  { %496 = vst [vmem:[#allocation2 + $0x38] sm:$0xff] %v427_v2 }
 0x152   :  { %v429_v8 = vpop.f32.mrf.mxu1 }
 0x153   :  { %v430_v10 = vadd.f32 %v878_v25, %v429_v8 }
 0x155   :  { %497 = vst [vmem:[#allocation2 + $0x40] sm:$0xff] %v430_v10  ;;  %591 = vmatmul.msk.bf16.gmra.mxu2 %vm351_vm1, %v311_v9 }
 0x15a   :  { %v431_v11 = vpop.f32.mrf.mxu1 }
 0x15b   :  { %v432_v15 = vadd.f32 %v878_v25, %v431_v11 }
 0x15d   :  { %498 = vst [vmem:[#allocation2 + $0x48] sm:$0xff] %v432_v15 }
 0x162   :  { %v434_v18 = vpop.f32.mrf.mxu1 }
 0x163   :  { %v435_v20 = vadd.f32 %v878_v25, %v434_v18 }
 0x165   :  { %499 = vst [vmem:[#allocation2 + $0x50] sm:$0xff] %v435_v20  ;;  %592 = vmatmul.msk.bf16.gmra.mxu2 %vm351_vm1, %v312_v19 }
 0x16a   :  { %v436_v22 = vpop.f32.mrf.mxu1 }
 0x16b   :  { %v437_v26 = vadd.f32 %v878_v25, %v436_v22 }
 0x16d   :  { %500 = vst [vmem:[#allocation2 + $0x58] sm:$0xff] %v437_v26 }
 0x172   :  { %v439_v30 = vpop.f32.mrf.mxu1 }
 0x173   :  { %v440_v32 = vadd.f32 %v878_v25, %v439_v30 }
 0x175   :  { %501 = vst [vmem:[#allocation2 + $0x60] sm:$0xff] %v440_v32  ;;  %593 = vmatmul.msk.bf16.gmra.mxu2 %vm351_vm1, %v313_v31 }
 0x17a   :  { %v441_v34 = vpop.f32.mrf.mxu1 }
 0x17b   :  { %v442_v37 = vadd.f32 %v878_v25, %v441_v34 }
 0x17d   :  { %502 = vst [vmem:[#allocation2 + $0x68] sm:$0xff] %v442_v37 }
 0x182   :  { %v444_v40 = vpop.f32.mrf.mxu1 }
 0x183   :  { %v445_v42 = vadd.f32 %v878_v25, %v444_v40 }
 0x185   :  { %503 = vst [vmem:[#allocation2 + $0x70] sm:$0xff] %v445_v42  ;;  %594 = vmatmul.msk.bf16.gmra.mxu2 %vm351_vm1, %v314_v41 }
 0x18a   :  { %v446_v43 = vpop.f32.mrf.mxu1 }
 0x18b   :  { %v447_v44 = vadd.f32 %v878_v25, %v446_v43 }
 0x18d   :  { %504 = vst [vmem:[#allocation2 + $0x78] sm:$0xff] %v447_v44 }
 0x198   :  { %v449_v45 = vpop.f32.mrf.mxu2 }
 0x199   :  { %v450_v46 = vadd.f32 %v878_v25, %v449_v45 }
 0x19b   :  { %505 = vst [vmem:[#allocation2 + $0x80] sm:$0xff] %v450_v46 }
 0x1a0   :  { %v451_v4 = vpop.f32.mrf.mxu2 }
 0x1a1   :  { %v452_v47 = vadd.f32 %v878_v25, %v451_v4 }
 0x1a3   :  { %506 = vst [vmem:[#allocation2 + $0x88] sm:$0xff] %v452_v47 }
 0x1a8   :  { %v454_v48 = vpop.f32.mrf.mxu2 }
 0x1a9   :  { %v455_v49 = vadd.f32 %v878_v25, %v454_v48 }
 0x1ab   :  { %507 = vst [vmem:[#allocation2 + $0x90] sm:$0xff] %v455_v49 }
 0x1b0   :  { %v456_v50 = vpop.f32.mrf.mxu2 }
 0x1b1   :  { %v457_v51 = vadd.f32 %v878_v25, %v456_v50 }
 0x1b3   :  { %508 = vst [vmem:[#allocation2 + $0x98] sm:$0xff] %v457_v51 }
 0x1b8   :  { %v459_v52 = vpop.f32.mrf.mxu2 }
 0x1b9   :  { %v460_v53 = vadd.f32 %v878_v25, %v459_v52 }
 0x1bb   :  { %509 = vst [vmem:[#allocation2 + $0xa0] sm:$0xff] %v460_v53 }
 0x1c0   :  { %v461_v54 = vpop.f32.mrf.mxu2 }
 0x1c1   :  { %v462_v55 = vadd.f32 %v878_v25, %v461_v54 }
 0x1c3   :  { %510 = vst [vmem:[#allocation2 + $0xa8] sm:$0xff] %v462_v55 }
 0x1c8   :  { %v464_v56 = vpop.f32.mrf.mxu2 }
 0x1c9   :  { %v465_v57 = vadd.f32 %v878_v25, %v464_v56 }
 0x1cb   :  { %511 = vst [vmem:[#allocation2 + $0xb0] sm:$0xff] %v465_v57 }
 0x1d0   :  { %v466_v58 = vpop.f32.mrf.mxu2 }
 0x1d1   :  { %v467_v59 = vadd.f32 %v878_v25, %v466_v58 }
 0x1d3   :  { %512 = vst [vmem:[#allocation2 + $0xb8] sm:$0xff] %v467_v59 }
 0x1d8   :  { %v469_v60 = vpop.f32.mrf.mxu2 }
 0x1d9   :  { %v470_v61 = vadd.f32 %v878_v25, %v469_v60 }
 0x1db   :  { %513 = vst [vmem:[#allocation2 + $0xc0] sm:$0xff] %v470_v61 }
 0x1e0   :  { %v471_v62 = vpop.f32.mrf.mxu2 }
 0x1e1   :  { %v472_v63 = vadd.f32 %v878_v25, %v471_v62 }
 0x1e3   :  { %514 = vst [vmem:[#allocation2 + $0xc8] sm:$0xff] %v472_v63 }
 0x1e8   :  { %v474_v3 = vpop.f32.mrf.mxu2 }
 0x1e9   :  { %v475_v0 = vadd.f32 %v878_v25, %v474_v3 }
 0x1eb   :  { %515 = vst [vmem:[#allocation2 + $0xd0] sm:$0xff] %v475_v0 }
 0x1f0   :  { %v476_v1 = vpop.f32.mrf.mxu2 }
 0x1f1   :  { %v477_v2 = vadd.f32 %v878_v25, %v476_v1 }
 0x1f3   :  { %516 = vst [vmem:[#allocation2 + $0xd8] sm:$0xff] %v477_v2 }
 0x1f8   :  { %v479_v5 = vpop.f32.mrf.mxu2 }
 0x1f9   :  { %v480_v6 = vadd.f32 %v878_v25, %v479_v5 }
 0x1fb   :  { %517 = vst [vmem:[#allocation2 + $0xe0] sm:$0xff] %v480_v6 }
 0x200   :  { %v481_v7 = vpop.f32.mrf.mxu2 }
 0x201   :  { %v482_v8 = vadd.f32 %v878_v25, %v481_v7 }
 0x203   :  { %518 = vst [vmem:[#allocation2 + $0xe8] sm:$0xff] %v482_v8 }
 0x208   :  { %v484_v9 = vpop.f32.mrf.mxu2 }
 0x209   :  { %v485_v10 = vadd.f32 %v878_v25, %v484_v9 }
 0x20b   :  { %519 = vst [vmem:[#allocation2 + $0xf0] sm:$0xff] %v485_v10 }
 0x210   :  { %v486_v11 = vpop.f32.mrf.mxu2 }
 0x211   :  { %v487_v12 = vadd.f32 %v878_v25, %v486_v11 }
 0x213   :  { %520 = vst [vmem:[#allocation2 + $0xf8] sm:$0xff] %v487_v12 }
 0x214   :  { %533 = dma.vmem_to_hbm [thread:$0]  %s526_s22, 4096, %s528_s24, [#allocation3], %s640_s25, %s640_s25, %s641_s26  }
 0x215   :  { %637 = dma.done.wait [#allocation3], 4096  }
 0x216   :  { %638 = vsyncadd [#allocation3], 4294963200 }
 0x217   :  { %538 = vsyncpa [#allocation3], 1 }

</bundles_post_ra>
